<compile_context>
chip_gen: v7x
topology: tpu7x:2x2x1
jax: 0.10.0
libtpu: 0.0.40
codegen_flags: <defaults>
</compile_context>

<pallas_src>
import functools

import jax
import jax.numpy as jnp
import numpy as np
from jax.experimental import pallas as pl
from jax.experimental.pallas import tpu as pltpu


# ----------------------------------------------------------------------------
# Kernels
# ----------------------------------------------------------------------------
def _linear_kernel_tiled(x_ref, w_ref, b_ref, o_ref, acc_ref, *, compute_dtype):
    # x_ref: (tm, tk), w_ref: (tk, tn), b_ref: (1, tn), o_ref: (tm, tn)
    # acc_ref: (tm, tn) f32 scratch, resident across the K grid axis.
    k = pl.program_id(2)

    @pl.when(k == 0)
    def _():
        # Fold the bias into the accumulator init (saves an epilogue VPU add).
        acc_ref[...] = jnp.broadcast_to(
            b_ref[...].astype(jnp.float32), acc_ref.shape
        )

    x = x_ref[...]
    w = w_ref[...]
    if compute_dtype is not None:  # opt-in bf16 MXU path, f32 accumulation
        x = x.astype(compute_dtype)
        w = w.astype(compute_dtype)
    acc_ref[...] += jnp.dot(x, w, preferred_element_type=jnp.float32)

    @pl.when(k == pl.num_programs(2) - 1)
    def _():
        o_ref[...] = acc_ref[...].astype(o_ref.dtype)


def _linear_kernel_resident(x_ref, w_ref, b_ref, o_ref, *, compute_dtype):
    # 1-D grid over M tiles; full (K, N) weight + (1, N) bias resident in VMEM.
    x = x_ref[...]
    w = w_ref[...]
    if compute_dtype is not None:
        x = x.astype(compute_dtype)
        w = w.astype(compute_dtype)
    acc = jnp.dot(x, w, preferred_element_type=jnp.float32)
    o_ref[...] = (acc + b_ref[...].astype(jnp.float32)).astype(o_ref.dtype)


# ----------------------------------------------------------------------------
# Tiling helpers
# ----------------------------------------------------------------------------
def _round_up(x, m):
    return ((x + m - 1) // m) * m


def _sublane_multiple(dtype):
    itemsize = jnp.dtype(dtype).itemsize
    return {4: 8, 2: 16, 1: 32}.get(itemsize, 8)


def _largest_divisor_tile(dim, align, cap):
    """Largest t with t % align == 0, dim % t == 0, t <= cap (dim % align == 0)."""
    cap = max(align, min(cap, dim))
    t = (cap // align) * align
    while t > align:
        if dim % t == 0:
            return t
        t -= align
    return align


def _choose_dim_tiling(dim, align, cap, fallback_tile=512):
    """Return (padded_dim, tile).  Pad only to `align`, then use the largest
    tile <= cap that divides the padded dim.  If that tile is degenerate
    (< 128 on a large dim, e.g. M = 8*prime), pad up to a round tile instead."""
    dim_a = _round_up(dim, align)
    t = _largest_divisor_tile(dim_a, align, cap)
    if t >= min(128, cap, dim_a):
        return dim_a, t
    tf = max(align, (min(fallback_tile, cap) // align) * align)
    return _round_up(dim_a, tf), tf


def _maybe_pad_2d(a, rows, cols):
    r, c = a.shape
    if r == rows and c == cols:
        return a
    return jnp.pad(a, ((0, rows - r), (0, cols - c)))


# ----------------------------------------------------------------------------
# Pallas wrappers
# ----------------------------------------------------------------------------
# Below this FLOP count a single XLA dot beats pallas_call launch overhead.
_PALLAS_MIN_FLOPS = 2 * 128 * 128 * 128
_WEIGHT_RESIDENT_BYTES = 8 * 1024 * 1024   # full (K, N) weight kept in VMEM
_WEIGHT_RESIDENT_MAX_DIM = 2048            # bounds the x / out tile footprint
_VMEM_LIMIT_BYTES = 48 * 1024 * 1024       # fits v7x (64 MiB phys) with headroom


def _linear_resident(x2d, weight, bias, compute_dtype, tm_cap):
    """Weight-resident fast path: grid over M only, full weight/bias in VMEM."""
    M, K = x2d.shape
    _, N = weight.shape
    out_dtype = x2d.dtype
    sub = _sublane_multiple(out_dtype)

    Mp, tm = _choose_dim_tiling(M, sub, tm_cap)
    # v7x megacore: make sure the (single) parallel axis has >= 2 blocks.
    if Mp // tm == 1 and Mp >= 2 * sub:
        tm = _largest_divisor_tile(Mp, sub, max(sub, tm // 2))

    xp = x2d if Mp == M else jnp.pad(x2d, ((0, Mp - M), (0, 0)))
    b2 = bias.reshape(1, N)

    itemsize = jnp.dtype(out_dtype).itemsize
    cost = pl.CostEstimate(
        flops=2 * Mp * K * N,
        transcendentals=0,
        bytes_accessed=(Mp * K + K * N + N + Mp * N) * itemsize,
    )
    kernel = functools.partial(_linear_kernel_resident, compute_dtype=compute_dtype)
    out = pl.pallas_call(
        kernel,
        out_shape=jax.ShapeDtypeStruct((Mp, N), out_dtype),
        grid_spec=pltpu.PrefetchScalarGridSpec(
            num_scalar_prefetch=0,
            grid=(Mp // tm,),
            in_specs=[
                pl.BlockSpec((tm, K), lambda i: (i, 0)),   # x streams over M tiles
                pl.BlockSpec((K, N), lambda i: (0, 0)),    # full weight, DMA'd once
                pl.BlockSpec((1, N), lambda i: (0, 0)),    # full bias
            ],
            out_specs=pl.BlockSpec((tm, N), lambda i: (i, 0)),
        ),
        compiler_params=pltpu.CompilerParams(
            dimension_semantics=("parallel",),
            vmem_limit_bytes=_VMEM_LIMIT_BYTES,
        ),
        cost_estimate=cost,
    )(xp, weight, b2)
    return out[:M] if Mp != M else out


def _linear_tiled(x2d, weight, bias, compute_dtype, tm_cap, tn_cap, tk_cap):
    """General 3-D tiled path with f32 VMEM accumulator over the K grid axis."""
    M, K = x2d.shape
    _, N = weight.shape
    out_dtype = x2d.dtype
    sub = _sublane_multiple(out_dtype)

    Mp, tm = _choose_dim_tiling(M, sub, tm_cap)
    Kp, tk = _choose_dim_tiling(K, 128, tk_cap)
    Np, tn = _choose_dim_tiling(N, 128, tn_cap)

    # v7x megacore: guarantee >= 2 blocks across the two parallel axes.
    if (Mp // tm) * (Np // tn) == 1:
        if Mp >= 2 * sub:
            tm = _largest_divisor_tile(Mp, sub, max(sub, tm // 2))
        elif Np >= 256:
            tn = _largest_divisor_tile(Np, 128, max(128, tn // 2))

    # Minimal zero-padding (zeros along K contribute nothing to the acc).
    xp = _maybe_pad_2d(x2d, Mp, Kp)
    wp = _maybe_pad_2d(weight, Kp, Np)
    bp = bias if Np == N else jnp.pad(bias, (0, Np - N))
    bp = bp.reshape(1, Np)

    grid = (Mp // tm, Np // tn, Kp // tk)
    itemsize = jnp.dtype(out_dtype).itemsize
    cost = pl.CostEstimate(
        flops=2 * Mp * Kp * Np,
        transcendentals=0,
        # x is re-read once per N tile, w once per M tile.
        bytes_accessed=(Mp * Kp * grid[1] + Kp * Np * grid[0] + Np + Mp * Np)
        * itemsize,
    )
    kernel = functools.partial(_linear_kernel_tiled, compute_dtype=compute_dtype)
    out = pl.pallas_call(
        kernel,
        out_shape=jax.ShapeDtypeStruct((Mp, Np), out_dtype),
        grid_spec=pltpu.PrefetchScalarGridSpec(
            num_scalar_prefetch=0,
            grid=grid,
            in_specs=[
                pl.BlockSpec((tm, tk), lambda i, j, k: (i, k)),  # x tile
                pl.BlockSpec((tk, tn), lambda i, j, k: (k, j)),  # weight tile
                pl.BlockSpec((1, tn), lambda i, j, k: (0, j)),   # bias tile
            ],
            out_specs=pl.BlockSpec((tm, tn), lambda i, j, k: (i, j)),
            scratch_shapes=[pltpu.VMEM((tm, tn), jnp.float32)],
        ),
        compiler_params=pltpu.CompilerParams(
            dimension_semantics=("parallel", "parallel", "arbitrary"),
            vmem_limit_bytes=_VMEM_LIMIT_BYTES,
        ),
        cost_estimate=cost,
    )(xp, wp, bp)
    if Mp != M or Np != N:
        out = out[:M, :N]
    return out


def _linear_2d_pallas(x2d, weight, bias, *, compute_dtype=None, force_path=None,
                      tile_caps=None):
    M, K = x2d.shape
    K2, N = weight.shape
    assert K == K2, "input feature dim must match weight rows"
    itemsize = jnp.dtype(x2d.dtype).itemsize

    resident = (
        K * N * itemsize <= _WEIGHT_RESIDENT_BYTES
        and K <= _WEIGHT_RESIDENT_MAX_DIM
        and N <= _WEIGHT_RESIDENT_MAX_DIM
    )
    if force_path == "resident":
        resident = True
    elif force_path == "tiled":
        resident = False

    if tile_caps is not None:
        tm_cap, tn_cap, tk_cap = tile_caps
    else:
        # Spend the VMEM budget on whichever operand is re-read from HBM more:
        # weight traffic ~ K*N*(Mp/tm), x traffic ~ M*K*(Np/tn).
        tm_cap, tn_cap = (1024, 512) if N > M else (512, 1024)
        tk_cap = 1024
        # Max per-step footprint (f32): 2x x-tile + 2x w-tile + 2x out-tile +
        # f32 acc ~= 19 MiB, well inside the 48 MiB limit (v7x: 64 MiB phys).

    if resident:
        return _linear_resident(x2d, weight, bias, compute_dtype, tm_cap)
    return _linear_tiled(x2d, weight, bias, compute_dtype, tm_cap, tn_cap, tk_cap)


def _linear_2d(x2d, weight, bias, *, use_pallas=None, compute_dtype=None,
               force_path=None, tile_caps=None):
    M, K = x2d.shape
    N = weight.shape[1]
    if use_pallas is None:
        use_pallas = (2 * M * K * N) >= _PALLAS_MIN_FLOPS
    if not use_pallas:
        # Tiny problem: plain XLA dot is strictly faster than a kernel launch.
        return x2d @ weight + bias
    return _linear_2d_pallas(x2d, weight, bias, compute_dtype=compute_dtype,
                             force_path=force_path, tile_caps=tile_caps)


def linear_forward(x, weight, bias, *, use_pallas=None, compute_dtype=None,
                   force_path=None, tile_caps=None):
    """Matches Linear.forward: handles 2D (M, in) and 3D (B, T, in) inputs."""
    if x.ndim == 3:
        batch_size, time_step, input_size = x.shape
        x2d = x.reshape(batch_size * time_step, input_size)
        out = _linear_2d(x2d, weight, bias, use_pallas=use_pallas,
                         compute_dtype=compute_dtype, force_path=force_path,
                         tile_caps=tile_caps)
        return out.reshape(batch_size, time_step, weight.shape[1])
    elif x.ndim == 2:
        return _linear_2d(x, weight, bias, use_pallas=use_pallas,
                          compute_dtype=compute_dtype, force_path=force_path,
                          tile_caps=tile_caps)
    else:
        raise ValueError("Fully Connected Layer: input must be a 2D or 3D tensor")


# ----------------------------------------------------------------------------
# Parameter init mirroring the PyTorch __init__ options
# ----------------------------------------------------------------------------
def init_linear_params(key, input_size, output_size,
                       weights_initializer="glorot", bias_initializer="zeros"):
    wkey, bkey = jax.random.split(key)
    if weights_initializer in ("glorot", "xavier"):
        w = jax.random.normal(wkey, (input_size, output_size), jnp.float32) * np.sqrt(
            2.0 / (input_size + output_size))
    elif weights_initializer == "he":
        w = jax.random.normal(wkey, (input_size, output_size), jnp.float32) * np.sqrt(
            2.0 / input_size)
    elif weights_initializer == "random":
        w = jax.random.normal(wkey, (input_size, output_size), jnp.float32)
    elif weights_initializer == "ones":
        w = jnp.ones((input_size, output_size), jnp.float32)
    elif weights_initializer == "zeros":
        w = jnp.zeros((input_size, output_size), jnp.float32)
    elif weights_initializer == "orthogonal":
        # QR of a gaussian, matching torch.nn.init.orthogonal_ semantics.
        rows, cols = input_size, output_size
        g = jax.random.normal(wkey, (max(rows, cols), min(rows, cols)), jnp.float32)
        q, r = jnp.linalg.qr(g)
        q = q * jnp.sign(jnp.diagonal(r))
        w = q if rows >= cols else q.T
    else:
        raise ValueError(f"unknown weights initializer: {weights_initializer}")

    if bias_initializer == "zeros":
        b = jnp.zeros((output_size,), jnp.float32)
    elif bias_initializer == "ones":
        b = jnp.ones((output_size,), jnp.float32)
    elif bias_initializer == "random":
        b = jax.random.normal(bkey, (output_size,), jnp.float32)
    else:
        raise ValueError(f"unknown bias initializer: {bias_initializer}")
    return w, b


# ----------------------------------------------------------------------------
# Demo / correctness check
# ----------------------------------------------------------------------------
def _np_ref(x, w, b):
    x64 = np.asarray(x, dtype=np.float64)
    w64 = np.asarray(w, dtype=np.float64)
    b64 = np.asarray(b, dtype=np.float64)
    return x64.reshape(-1, x64.shape[-1]) @ w64 + b64


if __name__ == "__main__":
    key = jax.random.PRNGKey(0)
    k_x1, k_p1, k_x2, k_p2 = jax.random.split(key, 4)

    # --- Test 1: small module-consistent shapes, weight-resident Pallas path --
    batch, time_step, input_size, output_size = 2, 8, 32, 16
    x3d = jax.random.normal(k_x1, (batch, time_step, input_size), jnp.float32)
    w1, b1 = init_linear_params(k_p1, input_size, output_size,
                                weights_initializer="glorot",
                                bias_initializer="random")

    out3d = jax.block_until_ready(linear_forward(x3d, w1, b1, use_pallas=True))
    ref3d = _np_ref(x3d, w1, b1).reshape(batch, time_step, output_size)
    np.testing.assert_allclose(np.asarray(out3d), ref3d, rtol=1e-4, atol=1e-4)

    x2d = x3d.reshape(batch * time_step, input_size)
    out2d = jax.block_until_ready(linear_forward(x2d, w1, b1, use_pallas=True))
    np.testing.assert_allclose(np.asarray(out2d), _np_ref(x2d, w1, b1),
                               rtol=1e-4, atol=1e-4)

    # Auto dispatch on this tiny shape falls back to plain XLA; check it too.
    out_auto = jax.block_until_ready(linear_forward(x3d, w1, b1))
    np.testing.assert_allclose(np.asarray(out_auto), ref3d, rtol=1e-4, atol=1e-4)

    # --- Test 2: M=600, K=520, N=260 (unaligned dims) -------------------------
    batch2, time2, in2, out2 = 4, 150, 520, 260
    x3d_b = jax.random.normal(k_x2, (batch2, time2, in2), jnp.float32)
    w2, b2 = init_linear_params(k_p2, in2, out2,
                                weights_initializer="he",
                                bias_initializer="ones")
    ref3d_b = _np_ref(x3d_b, w2, b2).reshape(batch2, time2, out2)

    # (a) auto: weight-resident fast path (~0.5 MiB weight lives in VMEM).
    out_res = jax.block_until_ready(linear_forward(x3d_b, w2, b2, use_pallas=True))
    np.testing.assert_allclose(np.asarray(out_res), ref3d_b, rtol=1e-4, atol=1e-4)

    # (b) forced general tiled path with small caps so the K-accumulation loop,
    #     M/N tiling and alignment padding are all exercised at small shapes.
    out_tiled = jax.block_until_ready(
        linear_forward(x3d_b, w2, b2, use_pallas=True, force_path="tiled",
                       tile_caps=(256, 128, 256)))
    np.testing.assert_allclose(np.asarray(out_tiled), ref3d_b, rtol=1e-4, atol=1e-4)

    # (c) opt-in bf16 MXU path (f32 accumulation) — looser tolerance.
    out_bf16 = jax.block_until_ready(
        linear_forward(x3d_b, w2, b2, use_pallas=True,
                       compute_dtype=jnp.bfloat16))
    np.testing.assert_allclose(np.asarray(out_bf16), ref3d_b, rtol=5e-2, atol=5e-2)

    print("KERNEL_OK")
</pallas_src>

<mosaic_0001>
module attributes {stable_mosaic.version = 11 : i64} {
  func.func @_linear_kernel_resident(%arg0: i32, %arg1: memref<8x32xf32, #tpu.memory_space<vmem>>, %arg2: memref<32x16xf32, #tpu.memory_space<vmem>>, %arg3: memref<1x16xf32, #tpu.memory_space<vmem>>, %arg4: memref<8x16xf32, #tpu.memory_space<vmem>>) attributes {dimension_semantics = [#tpu.dimension_semantics<parallel>], iteration_bounds = array<i64: 2>, scalar_prefetch = 0 : i64, scratch_operands = 0 : i64, tpu.core_type = #tpu.core_type<tc>, window_params = [{transform_indices = @transform_0, window_bounds = array<i64: 8, 32>}, {pipeline_mode = #tpu.pipeline_mode<synchronous>, transform_indices = @transform_1, window_bounds = array<i64: 32, 16>}, {pipeline_mode = #tpu.pipeline_mode<synchronous>, transform_indices = @transform_2, window_bounds = array<i64: 1, 16>}, {transform_indices = @transform_3, window_bounds = array<i64: 8, 16>}]} {
    %c0 = arith.constant 0 : index
    %c0_0 = arith.constant 0 : index
    %0 = vector.load %arg1[%c0, %c0_0] : memref<8x32xf32, #tpu.memory_space<vmem>>, vector<8x32xf32>
    %c0_1 = arith.constant 0 : index
    %c0_2 = arith.constant 0 : index
    %1 = vector.load %arg2[%c0_1, %c0_2] : memref<32x16xf32, #tpu.memory_space<vmem>>, vector<32x16xf32>
    %cst = arith.constant dense<0.000000e+00> : vector<8x16xf32>
    %2 = tpu.matmul %0, %1, %cst {dimension_numbers = #tpu.dot_dimension_numbers<[1], [0], [0], [1], [0, 0, 1, 1], [], []>} : vector<8x32xf32>, vector<32x16xf32>, vector<8x16xf32> -> vector<8x16xf32>
    %c0_3 = arith.constant 0 : index
    %c0_4 = arith.constant 0 : index
    %3 = vector.load %arg3[%c0_3, %c0_4] : memref<1x16xf32, #tpu.memory_space<vmem>>, vector<1x16xf32>
    %4 = vector.broadcast %3 : vector<1x16xf32> to vector<8x16xf32>
    %5 = arith.addf %2, %4 : vector<8x16xf32>
    %c0_5 = arith.constant 0 : index
    %c0_6 = arith.constant 0 : index
    %6 = vector.load %arg4[%c0_5, %c0_6] : memref<8x16xf32, #tpu.memory_space<vmem>>, vector<8x16xf32>
    tpu.vector_store %arg4[%c0_5, %c0_6], %5 {strides = array<i32>} : memref<8x16xf32, #tpu.memory_space<vmem>>, vector<8x16xf32>,
    return
  }
  func.func @transform_0(%arg0: i32) -> (i32, i32) {
    %c0_i32 = arith.constant 0 : i32
    %c0_i32_0 = arith.constant 0 : i32
    return %arg0, %c0_i32 : i32, i32
  }
  func.func @transform_1(%arg0: i32) -> (i32, i32) {
    %c0_i32 = arith.constant 0 : i32
    %c0_i32_0 = arith.constant 0 : i32
    %c0_i32_1 = arith.constant 0 : i32
    return %c0_i32, %c0_i32_0 : i32, i32
  }
  func.func @transform_2(%arg0: i32) -> (i32, i32) {
    %c0_i32 = arith.constant 0 : i32
    %c0_i32_0 = arith.constant 0 : i32
    %c0_i32_1 = arith.constant 0 : i32
    return %c0_i32, %c0_i32_0 : i32, i32
  }
  func.func @transform_3(%arg0: i32) -> (i32, i32) {
    %c0_i32 = arith.constant 0 : i32
    %c0_i32_0 = arith.constant 0 : i32
    return %arg0, %c0_i32 : i32, i32
  }
}

</mosaic_0001>

<bundles_post_ra>
// kernel: tpu_custom_call.1
= control target key start
LH: loop header
LB: loop body
LE: loop exit
PB: predicated region body
PF: predicated region fallthrough
CT: control target
= control target key end

     0   :  { %8 = vsyncpa [#allocation3], 0  ;;  %s606_s0 = inlined_call_operand.vmem [shape: f32[16,32], index: 0, kind: input, shape index: {}]   ;;  %s607_s1 = inlined_call_operand.vmem [shape: f32[32,16], index: 1, kind: input, shape index: {}]   ;;  %s608_s2 = inlined_call_operand.vmem [shape: f32[1,16], index: 2, kind: input, shape index: {}]   ;;  %s609_s3 = inlined_call_operand.hbm [shape: f32[16,16], index: 3, kind: output, shape index: {}]  }
   0x1   :  { %10 = vsyncpa [#allocation3 + $0x1], 0  ;;  %s491_s12 = smov 0   ;;  %s493_s13 = smov 0  }
   0x2   :  { %s495_s14 = smov 0   ;;  %s497_s15 = smov 0  }
   0x3 LB: > { %s512_s16 = sadd.s32 4294967295, %s465_s15   ;;  %s327_s17 = sadd.s32 4294967294, %s465_s15   ;;  %s465_s15 = sphi %s497_s15, %s615_s15   ;;  %s461_s14 = sphi %s495_s14, %s614_s14   ;;  %s457_s13 = sphi %s493_s13, %s613_s13   ;;  %s453_s12 = sphi %s491_s12, %s612_s12  }
   0x4   : > { %s516_s18 = sadd.s32 1, %s465_s15   ;;  %s91_s19 = sadd.s32 1, %s461_s14 }
   0x5   : > { %s88_s20 = ssub.s32 %s465_s15, %s516_s18  ;;  %p101_p0 = scmp.ne.s32.totalorder %s461_s14, %s457_s13 }
   0x6   : > { %p89_p1 = scmp.eq.s32.totalorder %s88_s20, 0  ;;  %p102_p2 = scmp.eq.s32.totalorder %s512_s16, 1 }
   0x7   : > { %p107_p3 = scmp.ne.s32.totalorder %s457_s13, %s453_s12  ;;  %p108_p4 = scmp.eq.s32.totalorder %s327_s17, 1 }
   0x8   : > { %s527_s21 = scalar_select %p89_p1, %s461_s14, %s91_s19  }
   0x9   : > { %p529_p5 = por %p102_p2, %p101_p0  ;;  %p533_p6 = por %p108_p4, %p107_p3 }
   0xa   : > { %p330_p7 = scmp.ge.s32.totalorder %s465_s15, 1  ;;  %p139_p8 = scmp.lt.s32.totalorder %s465_s15, 3 }
   0xc   : > { %p140_p9 = pnand %p330_p7, %p139_p8 }
   0xd   : > { %v167_v0 = vld [vmem:[%s607_s1] sm:$0xff] (!%p140_p9)  ;;  %v168_v1 = vld [vmem:[%s607_s1 + $0x8] sm:$0xff] (!%p140_p9)  ;;  %v169_v2 = vld [vmem:[%s607_s1 + $0x10] sm:$0xff] (!%p140_p9)  ;;  %v467_v3 = vmov (!%p140_p9), 0.0|0.0   ;;  %vm468_vm0 = vmmov (!%p140_p9), 0   ;;  %v469_v6 = vmov (!%p140_p9), 0.0  }
   0xe   : > { %143 = sbr.rel (%p140_p9) target bundleno = 254 (0xfe), region = 32  ;;  %355 = vmatprep.subr.bf16.mxu0 (!%p140_p9), %v467_v3  ;;  %v356_v4 = vpack.c.bf16 (!%p140_p9), %v168_v1, %v167_v0  ;;  %v170_v5 = vld [vmem:[%s607_s1 + $0x18] sm:$0xff] (!%p140_p9)  ;;  %352 = vmatprep.mubr.msk.f32.mxu0 (!%p140_p9), %vm468_vm0, %v469_v6  ;;  %p162_p10 = scmp.lt.s32.totalorder (!%p140_p9), %s512_s16, 1  ;;  %vm178_vm1 = vcmask (!%p140_p9), 261120   ;;  %v333_v9 = vld [vmem:[%s608_s2] ss:$0 sm:$0xff] (!%p140_p9) }
   0xf   : > { %v359_v7 = vpack.c.bf16 (!%p140_p9), %v170_v5, %v169_v2  ;;  %s159_s10 = sand.u32 (!%p140_p9), 1, %s457_s13   ;;  %s336_s20 = sshll.u32 (!%p140_p9), %s512_s16, 7  ;;  %vm252_vm2 = vcmask (!%p140_p9), 130048  }
  0x10   : > { %357 = vmatpush3.bf16.msra.mxu0 (!%p140_p9), %v356_v4  ;;  %s331_s11 = sshll.u32 (!%p140_p9), %s159_s10, 3  ;;  %s564_s28 = scalar_lea.hbm (!%p140_p9), %s609_s3, %s336_s20 }
  0x11   : > { %358 = vmatprep.subr.bf16.mxu0 (!%p140_p9), %v467_v3  ;;  %s161_s24 = scalar_lea.vmem (!%p140_p9), [#allocation2], %s331_s11  ;;  %s255_s29 = scalar_lea.sflag (!%p140_p9), [#allocation3], %s159_s10 }
  0x12   : > { %s268_s25 = sshll.u32 (!%p140_p9), %s161_s24, 4  ;;  %s566_s25 = int_to_ptr.vmem [resolvable:$true] %s268_s25 }
  0x13   : > { %s403_s30 = scalar_lea.vmem (!%p140_p9), %s566_s25, 128 }
  0x14   : > { %360 = vmatpush3.bf16.msra.mxu0 (!%p140_p9), %v359_v7  ;;  %p404_p11 = scmp.ne.s32.totalorder (!%p140_p9), %s566_s25, %s403_s30 }
  0x15   : > { %s163_s5 = scalar_select %p162_p10, %s512_s16, 1 }
  0x16   : > { %p405_p12 = pnand %p404_p11, %p529_p5  ;;  %s470_s16 = smov [#allocation2]  }
  0x17   : > { %s332_s6 = sshll.u32 %s163_s5, 3  ;;  %s407_s4 = sshll.u32 %s470_s16, 4  ;;  %s408_s4 = int_to_ptr.vmem [resolvable:$false] %s407_s4 }
  0x18   : > { %s165_s9 = scalar_lea.vmem %s606_s0, %s332_s6  ;;  %p406_p13 = pneg %p405_p12 }
  0x19   : > { %v166_v8 = vld [vmem:[%s165_s9] sm:$0xff]  ;;  %s409_s5 = scalar_lea.vmem %s408_s4, 256  ;;  %p410_p0 = scmp.lt.s32.totalorder %s566_s25, %s408_s4 }
  0x1a   : > { %353 = vmatmul.mubr.msk.f32.vlgmr.msra.gmra.mrb[0].mxu0 %vm178_vm1, %v166_v8  ;;  %p411_p1 = scmp.lt.s32.totalorder %s409_s5, %s403_s30 }
  0x1c   : > { %p412_p2 = por %p411_p1, %p410_p0 }
  0x1e   : > { %p413_p3 = pnand %p412_p2, %p406_p13 }
  0xed   : > { %v248_v10 = vpop.f32.mrb[0].mxu0 }
  0xee   : > { %v249_v11 = vadd.f32 %v333_v9, %v248_v10  ;;  %v354_v12 = vpop.f32.mrb[1].mxu0 }
  0xf0   : > { %253 = vst.msk [vmem:[%s161_s24] sm:$0xff] %vm252_vm2, %v249_v11 }
  0xf1   : > { %416 = shalt.err (!%p413_p3)
}
  0xf2   : > { %s417_s6 = scalar_lea.hbm %s564_s28, 128  ;;  %s421_s9 = scalar_lea.hbm %s609_s3, 256 }
  0xf3   : > { %p418_p4 = scmp.ne.s32.totalorder %s564_s28, %s417_s6  ;;  %p422_p9 = scmp.lt.u32.totalorder %s564_s28, %s609_s3 }
  0xf4   : > { %p423_p10 = scmp.lt.u32.totalorder %s421_s9, %s417_s6  ;;  %p425_p12 = scmp.lt.u32.totalorder %s417_s6, %s564_s28 }
  0xf5   : > { %p419_p7 = pnand %p418_p4, %p529_p5 }
  0xf6   : > { %p424_p11 = por %p423_p10, %p422_p9 }
  0xf7   : > { %p420_p8 = pneg %p419_p7 }
  0xf8   : > { %p426_p13 = por %p425_p12, %p424_p11 }
  0xfa   : > { %p427_p0 = pnand %p426_p13, %p420_p8 }
  0xfc   : > { %430 = shalt.err (!%p427_p0)
}
  0xfd   : > { %361 = dma.vmem_to_hbm [thread:$0]  (%p529_p5), %s566_s25, 128, %s564_s28, %s255_s29  }
  0xfe PF: > { %p367_p1 = scmp.ge.s32.totalorder %s465_s15, 2  ;;  %s280_s17 = sand.u32 1, %s453_s12  }
  0xff   : > { %s281_s19 = scalar_lea.sflag [#allocation3], %s280_s17 }
 0x100   : > { %p364_p2 = pnand %p367_p1, %p533_p6 }
 0x102   : > { %448 = dma.done.wait (!%p364_p2), %s281_s19, 128  }
 0x103   : > { %450 = vsyncadd (!%p364_p2), %s281_s19, 4294967168  ;;  %p13_p3 = scmp.ge.s32.totalorder %s516_s18, 4   ;;  %s612_s12 = smov %s457_s13 }
 0x104   : > { %s613_s13 = smov %s461_s14  ;;  %s614_s14 = smov %s527_s21 }
 0x105   : > { %s615_s15 = smov %s516_s18  ;;  %15 = sbr.rel (!%p13_p3) target bundleno = 3 (0x3), region = 67 }
 0x10c   :  { %286 = vsyncpa [#allocation3], 1 }
 0x10d   :  { %288 = vsyncpa [#allocation3 + $0x1], 1 }

</bundles_post_ra>
